<compile_context>
chip_gen: v6e
topology: v6e:2x2x1
jax: 0.10.0
libtpu: 0.0.40
codegen_flags: <defaults>
</compile_context>

<pallas_src>
import functools

import jax
import jax.numpy as jnp
from jax import lax
from jax.experimental import pallas as pl
from jax.experimental.pallas import tpu as pltpu

EPS = 1e-5
NEG_SLOPE = 0.01


def _critic_kernel(
    x_ref,
    w1_ref, g1_ref, beta1_ref,
    w2_ref, g2_ref, beta2_ref,
    w3_ref, b3_ref,
    o_ref,
    s1_ref, ss1_ref, s2_ref, ss2_ref,
    *, batch, tile_b,
):
    phase = pl.program_id(0)
    tile = pl.program_id(1)
    n_tiles = pl.num_programs(1)

    rem = batch % tile_b  # static Python int: rows valid in the last tile
    if rem:
        rows = lax.broadcasted_iota(jnp.int32, (tile_b, 1), 0)
        n_valid = jnp.where(tile == n_tiles - 1, rem, tile_b)
        row_mask = rows < n_valid
    else:
        row_mask = None

    def _masked(h):
        return h if row_mask is None else jnp.where(row_mask, h, 0.0)

    inv_b = jnp.float32(1.0 / batch)

    # Linear 1 without bias (bias cancels inside training-mode BN).
    u1 = jnp.dot(x_ref[...], w1_ref[...], preferred_element_type=jnp.float32)

    # ---- phase 0: accumulate BN1 batch statistics ----
    @pl.when(phase == 0)
    def _():
        @pl.when(tile == 0)
        def _():
            s1_ref[...] = jnp.zeros_like(s1_ref)
            ss1_ref[...] = jnp.zeros_like(ss1_ref)
            s2_ref[...] = jnp.zeros_like(s2_ref)
            ss2_ref[...] = jnp.zeros_like(ss2_ref)

        u1m = _masked(u1)
        s1_ref[...] += jnp.sum(u1m, axis=0, keepdims=True)
        ss1_ref[...] += jnp.sum(u1m * u1m, axis=0, keepdims=True)

    # ---- phases 1 & 2: folded BN1 + LeakyReLU + Linear2 ----
    @pl.when(phase > 0)
    def _():
        # One-time fold of BN1 into (scale, shift), stored over the stat refs.
        @pl.when(jnp.logical_and(phase == 1, tile == 0))
        def _():
            mean1 = s1_ref[...] * inv_b
            var1 = ss1_ref[...] * inv_b - mean1 * mean1
            scale1 = g1_ref[...] * lax.rsqrt(var1 + EPS)
            s1_ref[...] = scale1
            ss1_ref[...] = beta1_ref[...] - mean1 * scale1

        a1 = u1 * s1_ref[...] + ss1_ref[...]
        a1 = jnp.maximum(a1, NEG_SLOPE * a1)

        u2 = jnp.dot(a1.astype(jnp.bfloat16), w2_ref[...],
                     preferred_element_type=jnp.float32)

        @pl.when(phase == 1)
        def _():
            u2m = _masked(u2)
            s2_ref[...] += jnp.sum(u2m, axis=0, keepdims=True)
            ss2_ref[...] += jnp.sum(u2m * u2m, axis=0, keepdims=True)

        # ---- phase 2: folded BN2 + LeakyReLU + Linear3 -> output ----
        @pl.when(phase == 2)
        def _():
            @pl.when(tile == 0)
            def _():
                mean2 = s2_ref[...] * inv_b
                var2 = ss2_ref[...] * inv_b - mean2 * mean2
                scale2 = g2_ref[...] * lax.rsqrt(var2 + EPS)
                s2_ref[...] = scale2
                ss2_ref[...] = beta2_ref[...] - mean2 * scale2

            a2 = u2 * s2_ref[...] + ss2_ref[...]
            a2 = jnp.maximum(a2, NEG_SLOPE * a2)

            out = jnp.dot(a2.astype(jnp.bfloat16), w3_ref[...],
                          preferred_element_type=jnp.float32) + b3_ref[...]
            o_ref[...] = out.astype(o_ref.dtype)


def _round_up(n, m):
    return (n + m - 1) // m * m


def critic_forward(x, params, *, tb=1024):
    """x: [B, state_size] float32 -> [B, 1] float32 (training-mode BN)."""
    B, S = x.shape
    H = params["w1"].shape[1]

    tb = min(tb, _round_up(B, 8))
    tb = max(8, (tb // 8) * 8)  # sublane multiple
    n_tiles = pl.cdiv(B, tb)
    b_pad = n_tiles * tb

    # bf16 for HBM bandwidth of x and native-rate MXU matmuls.
    x_bf16 = x.astype(jnp.bfloat16)
    if b_pad != B:
        x_bf16 = jnp.pad(x_bf16, ((0, b_pad - B), (0, 0)))
    w1 = params["w1"].astype(jnp.bfloat16)
    w2 = params["w2"].astype(jnp.bfloat16)
    w3 = params["w3"].astype(jnp.bfloat16)

    # b1 / b2 cancel exactly under training-mode BatchNorm and are not needed.
    args = (
        x_bf16,
        w1, params["g1"], params["beta1"],
        w2, params["g2"], params["beta2"],
        w3, params["b3"],
    )

    x_spec = pl.BlockSpec((tb, S), lambda p, i: (i, 0))
    # Weights / BN params: constant index_map -> VMEM-resident across the grid.
    const_spec = lambda a: pl.BlockSpec(a.shape, lambda p, i: (0, 0))
    in_specs = [x_spec] + [const_spec(a) for a in args[1:]]
    # Output block stays parked on block 0 during phases 0/1 (never written),
    # and tracks the batch tile during phase 2 -> exactly one HBM writeback.
    # TODO(synk): output kept as (TB, 1) blocks (masked stores); a lane-dense
    # (1, TB) output would need an in-kernel transpose and the output is tiny
    # relative to x, so it is not the bottleneck here.
    out_spec = pl.BlockSpec((tb, 1), lambda p, i: (jnp.where(p == 2, i, 0), 0))

    flops = 2 * B * (3 * S * H + 2 * H * H + H)
    bytes_accessed = (3 * b_pad * S * 2            # x (bf16), read once per phase
                      + b_pad * 4                  # single output writeback
                      + (S * H + H * H + H) * 2    # bf16 weights
                      + (4 * H + 1) * 4)           # BN params + b3 (f32)

    grid_spec = pltpu.PrefetchScalarGridSpec(
        num_scalar_prefetch=0,
        grid=(3, n_tiles),
        in_specs=in_specs,
        out_specs=out_spec,
        scratch_shapes=[pltpu.VMEM((1, H), jnp.float32) for _ in range(4)],
    )

    # TODO(synk): splitting the batch-tile axis across the two v7x TensorCores
    # needs a cross-core (CMEM) reduction of the BN partial sums; both grid
    # axes are kept "arbitrary" (sequential) here for correctness.
    out = pl.pallas_call(
        functools.partial(_critic_kernel, batch=B, tile_b=tb),
        out_shape=jax.ShapeDtypeStruct((b_pad, 1), jnp.float32),
        grid_spec=grid_spec,
        compiler_params=pltpu.CompilerParams(
            dimension_semantics=("arbitrary", "arbitrary"),
            vmem_limit_bytes=32 * 1024 * 1024,
        ),
        cost_estimate=pl.CostEstimate(
            flops=flops,
            transcendentals=2 * H,
            bytes_accessed=bytes_accessed,
        ),
    )(*args)

    return out[:B] if b_pad != B else out


def init_params(key, state_size, hidden_size):
    """Deterministic synthetic parameters matching the PyTorch module's shapes."""
    ks = jax.random.split(key, 6)

    def linear(kw, kb, fan_in, fan_out):
        bound = 1.0 / float(jnp.sqrt(jnp.float32(fan_in)))
        w = jax.random.uniform(kw, (fan_in, fan_out), jnp.float32, -bound, bound)
        b = jax.random.uniform(kb, (1, fan_out), jnp.float32, -bound, bound)
        return w, b

    w1, b1 = linear(ks[0], ks[1], state_size, hidden_size)
    w2, b2 = linear(ks[2], ks[3], hidden_size, hidden_size)
    w3, b3 = linear(ks[4], ks[5], hidden_size, 1)
    return {
        "w1": w1, "b1": b1,
        "g1": jnp.ones((1, hidden_size), jnp.float32),
        "beta1": jnp.zeros((1, hidden_size), jnp.float32),
        "w2": w2, "b2": b2,
        "g2": jnp.ones((1, hidden_size), jnp.float32),
        "beta2": jnp.zeros((1, hidden_size), jnp.float32),
        "w3": w3, "b3": b3,
    }


def reference_f32(x, p):
    """PyTorch training-mode semantics, full f32 (loose sanity reference)."""
    h = x @ p["w1"] + p["b1"]
    mu = h.mean(0, keepdims=True)
    var = ((h - mu) ** 2).mean(0, keepdims=True)
    h = (h - mu) / jnp.sqrt(var + EPS) * p["g1"] + p["beta1"]
    h = jnp.where(h >= 0, h, NEG_SLOPE * h)
    h = h @ p["w2"] + p["b2"]
    mu = h.mean(0, keepdims=True)
    var = ((h - mu) ** 2).mean(0, keepdims=True)
    h = (h - mu) / jnp.sqrt(var + EPS) * p["g2"] + p["beta2"]
    h = jnp.where(h >= 0, h, NEG_SLOPE * h)
    return h @ p["w3"] + p["b3"]


def reference_kernel_numerics(x, p):
    """Same math as the kernel: bf16 MXU operands, f32 stats on bias-free
    pre-activations, BN folded into a single scale/shift."""
    def bn(u, g, beta):
        mu = u.mean(0, keepdims=True)
        var = (u * u).mean(0, keepdims=True) - mu * mu
        scale = g * lax.rsqrt(var + EPS)
        return u * scale + (beta - mu * scale)

    u = jnp.dot(x.astype(jnp.bfloat16), p["w1"].astype(jnp.bfloat16),
                preferred_element_type=jnp.float32)
    h = bn(u, p["g1"], p["beta1"])
    h = jnp.maximum(h, NEG_SLOPE * h)
    u = jnp.dot(h.astype(jnp.bfloat16), p["w2"].astype(jnp.bfloat16),
                preferred_element_type=jnp.float32)
    h = bn(u, p["g2"], p["beta2"])
    h = jnp.maximum(h, NEG_SLOPE * h)
    return jnp.dot(h.astype(jnp.bfloat16), p["w3"].astype(jnp.bfloat16),
                   preferred_element_type=jnp.float32) + p["b3"]


if __name__ == "__main__":
    state_size, action_size, hidden_size = 16, 4, 32
    batch = 200  # exercises 4 batch tiles (tb=64) incl. a ragged last tile

    key = jax.random.PRNGKey(0)
    k_x, k_p = jax.random.split(key)
    x = jax.random.normal(k_x, (batch, state_size), jnp.float32)
    params = init_params(k_p, state_size, hidden_size)

    out = critic_forward(x, params, tb=64)
    out = jax.block_until_ready(out)
    assert out.shape == (batch, 1)

    # Tight check against a pure-JAX reference with identical numerics.
    ref_exact = reference_kernel_numerics(x, params)
    assert jnp.allclose(out, ref_exact, atol=2e-3, rtol=2e-3), float(
        jnp.max(jnp.abs(out - ref_exact)))

    # Loose check against full-f32 PyTorch training-mode semantics
    # (bf16 matmul operands introduce ~1e-2 level differences).
    ref32 = reference_f32(x, params)
    assert jnp.allclose(out, ref32, atol=1e-1, rtol=1e-1), float(
        jnp.max(jnp.abs(out - ref32)))

    print("KERNEL_OK")
</pallas_src>

<mosaic_0001>
module attributes {stable_mosaic.version = 11 : i64} {
  func.func @_critic_kernel(%arg0: i32, %arg1: i32, %arg2: memref<64x16xbf16, #tpu.memory_space<vmem>>, %arg3: memref<16x32xbf16, #tpu.memory_space<vmem>>, %arg4: memref<1x32xf32, #tpu.memory_space<vmem>>, %arg5: memref<1x32xf32, #tpu.memory_space<vmem>>, %arg6: memref<32x32xbf16, #tpu.memory_space<vmem>>, %arg7: memref<1x32xf32, #tpu.memory_space<vmem>>, %arg8: memref<1x32xf32, #tpu.memory_space<vmem>>, %arg9: memref<32x1xbf16, #tpu.memory_space<vmem>>, %arg10: memref<1x1xf32, #tpu.memory_space<vmem>>, %arg11: memref<64x1xf32, #tpu.memory_space<vmem>>, %arg12: memref<1x32xf32, #tpu.memory_space<vmem>>, %arg13: memref<1x32xf32, #tpu.memory_space<vmem>>, %arg14: memref<1x32xf32, #tpu.memory_space<vmem>>, %arg15: memref<1x32xf32, #tpu.memory_space<vmem>>) attributes {dimension_semantics = [#tpu.dimension_semantics<arbitrary>, #tpu.dimension_semantics<arbitrary>], iteration_bounds = array<i64: 3, 4>, scalar_prefetch = 0 : i64, scratch_operands = 4 : i64, tpu.core_type = #tpu.core_type<tc>, window_params = [{transform_indices = @transform_0, window_bounds = array<i64: 64, 16>}, {pipeline_mode = #tpu.pipeline_mode<synchronous>, transform_indices = @transform_1, window_bounds = array<i64: 16, 32>}, {pipeline_mode = #tpu.pipeline_mode<synchronous>, transform_indices = @transform_2, window_bounds = array<i64: 1, 32>}, {pipeline_mode = #tpu.pipeline_mode<synchronous>, transform_indices = @transform_3, window_bounds = array<i64: 1, 32>}, {pipeline_mode = #tpu.pipeline_mode<synchronous>, transform_indices = @transform_4, window_bounds = array<i64: 32, 32>}, {pipeline_mode = #tpu.pipeline_mode<synchronous>, transform_indices = @transform_5, window_bounds = array<i64: 1, 32>}, {pipeline_mode = #tpu.pipeline_mode<synchronous>, transform_indices = @transform_6, window_bounds = array<i64: 1, 32>}, {pipeline_mode = #tpu.pipeline_mode<synchronous>, transform_indices = @transform_7, window_bounds = array<i64: 32, 1>}, {pipeline_mode = #tpu.pipeline_mode<synchronous>, transform_indices = @transform_8, window_bounds = array<i64: 1, 1>}, {transform_indices = @transform_9, window_bounds = array<i64: 64, 1>}]} {
    %0 = tpu.iota {dimensions = array<i32: 0>} : vector<64x1xi32>
    %c3_i32 = arith.constant 3 : i32
    %1 = arith.cmpi eq, %arg1, %c3_i32 : i32
    %c8_i32 = arith.constant 8 : i32
    %c64_i32 = arith.constant 64 : i32
    %2 = arith.select %1, %c8_i32, %c64_i32 : i32
    %3 = vector.broadcast %2 : i32 to vector<64x1xi32>
    %4 = arith.cmpi slt, %0, %3 : vector<64x1xi32>
    %c0 = arith.constant 0 : index
    %c0_0 = arith.constant 0 : index
    %5 = vector.load %arg2[%c0, %c0_0] : memref<64x16xbf16, #tpu.memory_space<vmem>>, vector<64x16xbf16>
    %c0_1 = arith.constant 0 : index
    %c0_2 = arith.constant 0 : index
    %6 = vector.load %arg3[%c0_1, %c0_2] : memref<16x32xbf16, #tpu.memory_space<vmem>>, vector<16x32xbf16>
    %cst = arith.constant dense<0.000000e+00> : vector<64x32xf32>
    %7 = tpu.matmul %5, %6, %cst {dimension_numbers = #tpu.dot_dimension_numbers<[1], [0], [0], [1], [0, 0, 1, 1], [], []>} : vector<64x16xbf16>, vector<16x32xbf16>, vector<64x32xf32> -> vector<64x32xf32>
    %c0_i32 = arith.constant 0 : i32
    %8 = arith.cmpi eq, %arg0, %c0_i32 : i32
    %9 = arith.extui %8 : i1 to i32
    %c0_i32_3 = arith.constant 0 : i32
    %10 = arith.cmpi ne, %9, %c0_i32_3 : i32
    scf.if %10 {
      %c0_i32_7 = arith.constant 0 : i32
      %14 = arith.cmpi eq, %arg1, %c0_i32_7 : i32
      %15 = arith.extui %14 : i1 to i32
      %c0_i32_8 = arith.constant 0 : i32
      %16 = arith.cmpi ne, %15, %c0_i32_8 : i32
      scf.if %16 {
        %cst_20 = arith.constant 0.000000e+00 : f32
        %32 = vector.broadcast %cst_20 : f32 to vector<1x32xf32>
        %c0_21 = arith.constant 0 : index
        %c0_22 = arith.constant 0 : index
        %33 = vector.load %arg12[%c0_21, %c0_22] : memref<1x32xf32, #tpu.memory_space<vmem>>, vector<1x32xf32>
        tpu.vector_store %arg12[%c0_21, %c0_22], %32 {strides = array<i32>} : memref<1x32xf32, #tpu.memory_space<vmem>>, vector<1x32xf32>,
        %cst_23 = arith.constant 0.000000e+00 : f32
        %34 = vector.broadcast %cst_23 : f32 to vector<1x32xf32>
        %c0_24 = arith.constant 0 : index
        %c0_25 = arith.constant 0 : index
        %35 = vector.load %arg13[%c0_24, %c0_25] : memref<1x32xf32, #tpu.memory_space<vmem>>, vector<1x32xf32>
        tpu.vector_store %arg13[%c0_24, %c0_25], %34 {strides = array<i32>} : memref<1x32xf32, #tpu.memory_space<vmem>>, vector<1x32xf32>,
        %cst_26 = arith.constant 0.000000e+00 : f32
        %36 = vector.broadcast %cst_26 : f32 to vector<1x32xf32>
        %c0_27 = arith.constant 0 : index
        %c0_28 = arith.constant 0 : index
        %37 = vector.load %arg14[%c0_27, %c0_28] : memref<1x32xf32, #tpu.memory_space<vmem>>, vector<1x32xf32>
        tpu.vector_store %arg14[%c0_27, %c0_28], %36 {strides = array<i32>} : memref<1x32xf32, #tpu.memory_space<vmem>>, vector<1x32xf32>,
        %cst_29 = arith.constant 0.000000e+00 : f32
        %38 = vector.broadcast %cst_29 : f32 to vector<1x32xf32>
        %c0_30 = arith.constant 0 : index
        %c0_31 = arith.constant 0 : index
        %39 = vector.load %arg15[%c0_30, %c0_31] : memref<1x32xf32, #tpu.memory_space<vmem>>, vector<1x32xf32>
        tpu.vector_store %arg15[%c0_30, %c0_31], %38 {strides = array<i32>} : memref<1x32xf32, #tpu.memory_space<vmem>>, vector<1x32xf32>,
      } else {
      }
      %cst_9 = arith.constant 0.000000e+00 : f32
      %17 = vector.shape_cast %4 : vector<64x1xi1> to vector<64x1xi1>
      %18 = vector.broadcast %17 : vector<64x1xi1> to vector<64x32xi1>
      %19 = vector.broadcast %cst_9 : f32 to vector<64x32xf32>
      %20 = arith.select %18, %7, %19 : vector<64x32xi1>, vector<64x32xf32>
      %c0_10 = arith.constant 0 : index
      %c0_11 = arith.constant 0 : index
      %21 = vector.load %arg12[%c0_10, %c0_11] : memref<1x32xf32, #tpu.memory_space<vmem>>, vector<1x32xf32>
      %cst_12 = arith.constant dense<0.000000e+00> : vector<32xf32>
      %22 = vector.multi_reduction <add>, %20, %cst_12 [0] : vector<64x32xf32> to vector<32xf32>
      %23 = vector.shape_cast %22 : vector<32xf32> to vector<1x32xf32>
      %24 = arith.addf %21, %23 : vector<1x32xf32>
      %c0_13 = arith.constant 0 : index
      %c0_14 = arith.constant 0 : index
      %25 = vector.load %arg12[%c0_13, %c0_14] : memref<1x32xf32, #tpu.memory_space<vmem>>, vector<1x32xf32>
      tpu.vector_store %arg12[%c0_13, %c0_14], %24 {strides = array<i32>} : memref<1x32xf32, #tpu.memory_space<vmem>>, vector<1x32xf32>,
      %c0_15 = arith.constant 0 : index
      %c0_16 = arith.constant 0 : index
      %26 = vector.load %arg13[%c0_15, %c0_16] : memref<1x32xf32, #tpu.memory_space<vmem>>, vector<1x32xf32>
      %27 = arith.mulf %20, %20 : vector<64x32xf32>
      %cst_17 = arith.constant dense<0.000000e+00> : vector<32xf32>
      %28 = vector.multi_reduction <add>, %27, %cst_17 [0] : vector<64x32xf32> to vector<32xf32>
      %29 = vector.shape_cast %28 : vector<32xf32> to vector<1x32xf32>
      %30 = arith.addf %26, %29 : vector<1x32xf32>
      %c0_18 = arith.constant 0 : index
      %c0_19 = arith.constant 0 : index
      %31 = vector.load %arg13[%c0_18, %c0_19] : memref<1x32xf32, #tpu.memory_space<vmem>>, vector<1x32xf32>
      tpu.vector_store %arg13[%c0_18, %c0_19], %30 {strides = array<i32>} : memref<1x32xf32, #tpu.memory_space<vmem>>, vector<1x32xf32>,
    } else {
    }
    %c0_i32_4 = arith.constant 0 : i32
    %11 = arith.cmpi sgt, %arg0, %c0_i32_4 : i32
    %12 = arith.extui %11 : i1 to i32
    %cst_5 = arith.constant 5.000000e-03 : f32
    %c0_i32_6 = arith.constant 0 : i32
    %13 = arith.cmpi ne, %12, %c0_i32_6 : i32
    scf.if %13 {
      %c1_i32 = arith.constant 1 : i32
      %14 = arith.cmpi eq, %arg0, %c1_i32 : i32
      %c0_i32_7 = arith.constant 0 : i32
      %15 = arith.cmpi eq, %arg1, %c0_i32_7 : i32
      %16 = arith.andi %14, %15 : i1
      %17 = arith.extui %16 : i1 to i32
      %c0_i32_8 = arith.constant 0 : i32
      %18 = arith.cmpi ne, %17, %c0_i32_8 : i32
      scf.if %18 {
        %c0_20 = arith.constant 0 : index
        %c0_21 = arith.constant 0 : index
        %37 = vector.load %arg12[%c0_20, %c0_21] : memref<1x32xf32, #tpu.memory_space<vmem>>, vector<1x32xf32>
        %38 = vector.broadcast %cst_5 : f32 to vector<1x32xf32>
        %39 = arith.mulf %37, %38 : vector<1x32xf32>
        %c0_22 = arith.constant 0 : index
        %c0_23 = arith.constant 0 : index
        %40 = vector.load %arg13[%c0_22, %c0_23] : memref<1x32xf32, #tpu.memory_space<vmem>>, vector<1x32xf32>
        %41 = vector.broadcast %cst_5 : f32 to vector<1x32xf32>
        %42 = arith.mulf %40, %41 : vector<1x32xf32>
        %43 = arith.mulf %39, %39 : vector<1x32xf32>
        %44 = arith.subf %42, %43 : vector<1x32xf32>
        %c0_24 = arith.constant 0 : index
        %c0_25 = arith.constant 0 : index
        %45 = vector.load %arg4[%c0_24, %c0_25] : memref<1x32xf32, #tpu.memory_space<vmem>>, vector<1x32xf32>
        %cst_26 = arith.constant 9.99999974E-6 : f32
        %46 = vector.broadcast %cst_26 : f32 to vector<1x32xf32>
        %47 = arith.addf %44, %46 : vector<1x32xf32>
        %48 = math.rsqrt %47 : vector<1x32xf32>
        %49 = arith.mulf %45, %48 : vector<1x32xf32>
        %c0_27 = arith.constant 0 : index
        %c0_28 = arith.constant 0 : index
        %50 = vector.load %arg12[%c0_27, %c0_28] : memref<1x32xf32, #tpu.memory_space<vmem>>, vector<1x32xf32>
        tpu.vector_store %arg12[%c0_27, %c0_28], %49 {strides = array<i32>} : memref<1x32xf32, #tpu.memory_space<vmem>>, vector<1x32xf32>,
        %c0_29 = arith.constant 0 : index
        %c0_30 = arith.constant 0 : index
        %51 = vector.load %arg5[%c0_29, %c0_30] : memref<1x32xf32, #tpu.memory_space<vmem>>, vector<1x32xf32>
        %52 = arith.mulf %39, %49 : vector<1x32xf32>
        %53 = arith.subf %51, %52 : vector<1x32xf32>
        %c0_31 = arith.constant 0 : index
        %c0_32 = arith.constant 0 : index
        %54 = vector.load %arg13[%c0_31, %c0_32] : memref<1x32xf32, #tpu.memory_space<vmem>>, vector<1x32xf32>
        tpu.vector_store %arg13[%c0_31, %c0_32], %53 {strides = array<i32>} : memref<1x32xf32, #tpu.memory_space<vmem>>, vector<1x32xf32>,
      } else {
      }
      %c0_9 = arith.constant 0 : index
      %c0_10 = arith.constant 0 : index
      %19 = vector.load %arg12[%c0_9, %c0_10] : memref<1x32xf32, #tpu.memory_space<vmem>>, vector<1x32xf32>
      %20 = vector.broadcast %19 : vector<1x32xf32> to vector<64x32xf32>
      %21 = arith.mulf %7, %20 : vector<64x32xf32>
      %c0_11 = arith.constant 0 : index
      %c0_12 = arith.constant 0 : index
      %22 = vector.load %arg13[%c0_11, %c0_12] : memref<1x32xf32, #tpu.memory_space<vmem>>, vector<1x32xf32>
      %23 = vector.broadcast %22 : vector<1x32xf32> to vector<64x32xf32>
      %24 = arith.addf %21, %23 : vector<64x32xf32>
      %cst_13 = arith.constant 0.00999999977 : f32
      %25 = vector.broadcast %cst_13 : f32 to vector<64x32xf32>
      %26 = arith.mulf %25, %24 : vector<64x32xf32>
      %27 = arith.maximumf %24, %26 : vector<64x32xf32>
      %28 = arith.truncf %27 : vector<64x32xf32> to vector<64x32xbf16>
      %c0_14 = arith.constant 0 : index
      %c0_15 = arith.constant 0 : index
      %29 = vector.load %arg6[%c0_14, %c0_15] : memref<32x32xbf16, #tpu.memory_space<vmem>>, vector<32x32xbf16>
      %cst_16 = arith.constant dense<0.000000e+00> : vector<64x32xf32>
      %30 = tpu.matmul %28, %29, %cst_16 {dimension_numbers = #tpu.dot_dimension_numbers<[1], [0], [0], [1], [0, 0, 1, 1], [], []>} : vector<64x32xbf16>, vector<32x32xbf16>, vector<64x32xf32> -> vector<64x32xf32>
      %c1_i32_17 = arith.constant 1 : i32
      %31 = arith.cmpi eq, %arg0, %c1_i32_17 : i32
      %32 = arith.extui %31 : i1 to i32
      %c0_i32_18 = arith.constant 0 : i32
      %33 = arith.cmpi ne, %32, %c0_i32_18 : i32
      scf.if %33 {
        %cst_20 = arith.constant 0.000000e+00 : f32
        %37 = vector.shape_cast %4 : vector<64x1xi1> to vector<64x1xi1>
        %38 = vector.broadcast %37 : vector<64x1xi1> to vector<64x32xi1>
        %39 = vector.broadcast %cst_20 : f32 to vector<64x32xf32>
        %40 = arith.select %38, %30, %39 : vector<64x32xi1>, vector<64x32xf32>
        %c0_21 = arith.constant 0 : index
        %c0_22 = arith.constant 0 : index
        %41 = vector.load %arg14[%c0_21, %c0_22] : memref<1x32xf32, #tpu.memory_space<vmem>>, vector<1x32xf32>
        %cst_23 = arith.constant dense<0.000000e+00> : vector<32xf32>
        %42 = vector.multi_reduction <add>, %40, %cst_23 [0] : vector<64x32xf32> to vector<32xf32>
        %43 = vector.shape_cast %42 : vector<32xf32> to vector<1x32xf32>
        %44 = arith.addf %41, %43 : vector<1x32xf32>
        %c0_24 = arith.constant 0 : index
        %c0_25 = arith.constant 0 : index
        %45 = vector.load %arg14[%c0_24, %c0_25] : memref<1x32xf32, #tpu.memory_space<vmem>>, vector<1x32xf32>
        tpu.vector_store %arg14[%c0_24, %c0_25], %44 {strides = array<i32>} : memref<1x32xf32, #tpu.memory_space<vmem>>, vector<1x32xf32>,
        %c0_26 = arith.constant 0 : index
        %c0_27 = arith.constant 0 : index
        %46 = vector.load %arg15[%c0_26, %c0_27] : memref<1x32xf32, #tpu.memory_space<vmem>>, vector<1x32xf32>
        %47 = arith.mulf %40, %40 : vector<64x32xf32>
        %cst_28 = arith.constant dense<0.000000e+00> : vector<32xf32>
        %48 = vector.multi_reduction <add>, %47, %cst_28 [0] : vector<64x32xf32> to vector<32xf32>
        %49 = vector.shape_cast %48 : vector<32xf32> to vector<1x32xf32>
        %50 = arith.addf %46, %49 : vector<1x32xf32>
        %c0_29 = arith.constant 0 : index
        %c0_30 = arith.constant 0 : index
        %51 = vector.load %arg15[%c0_29, %c0_30] : memref<1x32xf32, #tpu.memory_space<vmem>>, vector<1x32xf32>
        tpu.vector_store %arg15[%c0_29, %c0_30], %50 {strides = array<i32>} : memref<1x32xf32, #tpu.memory_space<vmem>>, vector<1x32xf32>,
      } else {
      }
      %c2_i32 = arith.constant 2 : i32
      %34 = arith.cmpi eq, %arg0, %c2_i32 : i32
      %35 = arith.extui %34 : i1 to i32
      %c0_i32_19 = arith.constant 0 : i32
      %36 = arith.cmpi ne, %35, %c0_i32_19 : i32
      scf.if %36 {
        %c0_i32_20 = arith.constant 0 : i32
        %37 = arith.cmpi eq, %arg1, %c0_i32_20 : i32
        %38 = arith.extui %37 : i1 to i32
        %c0_i32_21 = arith.constant 0 : i32
        %39 = arith.cmpi ne, %38, %c0_i32_21 : i32
        scf.if %39 {
          %c0_34 = arith.constant 0 : index
          %c0_35 = arith.constant 0 : index
          %56 = vector.load %arg14[%c0_34, %c0_35] : memref<1x32xf32, #tpu.memory_space<vmem>>, vector<1x32xf32>
          %57 = vector.broadcast %cst_5 : f32 to vector<1x32xf32>
          %58 = arith.mulf %56, %57 : vector<1x32xf32>
          %c0_36 = arith.constant 0 : index
          %c0_37 = arith.constant 0 : index
          %59 = vector.load %arg15[%c0_36, %c0_37] : memref<1x32xf32, #tpu.memory_space<vmem>>, vector<1x32xf32>
          %60 = vector.broadcast %cst_5 : f32 to vector<1x32xf32>
          %61 = arith.mulf %59, %60 : vector<1x32xf32>
          %62 = arith.mulf %58, %58 : vector<1x32xf32>
          %63 = arith.subf %61, %62 : vector<1x32xf32>
          %c0_38 = arith.constant 0 : index
          %c0_39 = arith.constant 0 : index
          %64 = vector.load %arg7[%c0_38, %c0_39] : memref<1x32xf32, #tpu.memory_space<vmem>>, vector<1x32xf32>
          %cst_40 = arith.constant 9.99999974E-6 : f32
          %65 = vector.broadcast %cst_40 : f32 to vector<1x32xf32>
          %66 = arith.addf %63, %65 : vector<1x32xf32>
          %67 = math.rsqrt %66 : vector<1x32xf32>
          %68 = arith.mulf %64, %67 : vector<1x32xf32>
          %c0_41 = arith.constant 0 : index
          %c0_42 = arith.constant 0 : index
          %69 = vector.load %arg14[%c0_41, %c0_42] : memref<1x32xf32, #tpu.memory_space<vmem>>, vector<1x32xf32>
          tpu.vector_store %arg14[%c0_41, %c0_42], %68 {strides = array<i32>} : memref<1x32xf32, #tpu.memory_space<vmem>>, vector<1x32xf32>,
          %c0_43 = arith.constant 0 : index
          %c0_44 = arith.constant 0 : index
          %70 = vector.load %arg8[%c0_43, %c0_44] : memref<1x32xf32, #tpu.memory_space<vmem>>, vector<1x32xf32>
          %71 = arith.mulf %58, %68 : vector<1x32xf32>
          %72 = arith.subf %70, %71 : vector<1x32xf32>
          %c0_45 = arith.constant 0 : index
          %c0_46 = arith.constant 0 : index
          %73 = vector.load %arg15[%c0_45, %c0_46] : memref<1x32xf32, #tpu.memory_space<vmem>>, vector<1x32xf32>
          tpu.vector_store %arg15[%c0_45, %c0_46], %72 {strides = array<i32>} : memref<1x32xf32, #tpu.memory_space<vmem>>, vector<1x32xf32>,
        } else {
        }
        %c0_22 = arith.constant 0 : index
        %c0_23 = arith.constant 0 : index
        %40 = vector.load %arg14[%c0_22, %c0_23] : memref<1x32xf32, #tpu.memory_space<vmem>>, vector<1x32xf32>
        %41 = vector.broadcast %40 : vector<1x32xf32> to vector<64x32xf32>
        %42 = arith.mulf %30, %41 : vector<64x32xf32>
        %c0_24 = arith.constant 0 : index
        %c0_25 = arith.constant 0 : index
        %43 = vector.load %arg15[%c0_24, %c0_25] : memref<1x32xf32, #tpu.memory_space<vmem>>, vector<1x32xf32>
        %44 = vector.broadcast %43 : vector<1x32xf32> to vector<64x32xf32>
        %45 = arith.addf %42, %44 : vector<64x32xf32>
        %cst_26 = arith.constant 0.00999999977 : f32
        %46 = vector.broadcast %cst_26 : f32 to vector<64x32xf32>
        %47 = arith.mulf %46, %45 : vector<64x32xf32>
        %48 = arith.maximumf %45, %47 : vector<64x32xf32>
        %49 = arith.truncf %48 : vector<64x32xf32> to vector<64x32xbf16>
        %c0_27 = arith.constant 0 : index
        %c0_28 = arith.constant 0 : index
        %50 = vector.load %arg9[%c0_27, %c0_28] : memref<32x1xbf16, #tpu.memory_space<vmem>>, vector<32x1xbf16>
        %cst_29 = arith.constant dense<0.000000e+00> : vector<64x1xf32>
        %51 = tpu.matmul %49, %50, %cst_29 {dimension_numbers = #tpu.dot_dimension_numbers<[1], [0], [0], [1], [0, 0, 1, 1], [], []>} : vector<64x32xbf16>, vector<32x1xbf16>, vector<64x1xf32> -> vector<64x1xf32>
        %c0_30 = arith.constant 0 : index
        %c0_31 = arith.constant 0 : index
        %52 = vector.load %arg10[%c0_30, %c0_31] : memref<1x1xf32, #tpu.memory_space<vmem>>, vector<1x1xf32>
        %53 = vector.broadcast %52 : vector<1x1xf32> to vector<64x1xf32>
        %54 = arith.addf %51, %53 : vector<64x1xf32>
        %c0_32 = arith.constant 0 : index
        %c0_33 = arith.constant 0 : index
        %55 = vector.load %arg11[%c0_32, %c0_33] : memref<64x1xf32, #tpu.memory_space<vmem>>, vector<64x1xf32>
        tpu.vector_store %arg11[%c0_32, %c0_33], %54 {strides = array<i32>} : memref<64x1xf32, #tpu.memory_space<vmem>>, vector<64x1xf32>,
      } else {
      }
    } else {
    }
    return
  }
  func.func @transform_0(%arg0: i32, %arg1: i32) -> (i32, i32) {
    %c0_i32 = arith.constant 0 : i32
    %c0_i32_0 = arith.constant 0 : i32
    return %arg1, %c0_i32 : i32, i32
  }
  func.func @transform_1(%arg0: i32, %arg1: i32) -> (i32, i32) {
    %c0_i32 = arith.constant 0 : i32
    %c0_i32_0 = arith.constant 0 : i32
    %c0_i32_1 = arith.constant 0 : i32
    return %c0_i32, %c0_i32_0 : i32, i32
  }
  func.func @transform_2(%arg0: i32, %arg1: i32) -> (i32, i32) {
    %c0_i32 = arith.constant 0 : i32
    %c0_i32_0 = arith.constant 0 : i32
    %c0_i32_1 = arith.constant 0 : i32
    return %c0_i32, %c0_i32_0 : i32, i32
  }
  func.func @transform_3(%arg0: i32, %arg1: i32) -> (i32, i32) {
    %c0_i32 = arith.constant 0 : i32
    %c0_i32_0 = arith.constant 0 : i32
    %c0_i32_1 = arith.constant 0 : i32
    return %c0_i32, %c0_i32_0 : i32, i32
  }
  func.func @transform_4(%arg0: i32, %arg1: i32) -> (i32, i32) {
    %c0_i32 = arith.constant 0 : i32
    %c0_i32_0 = arith.constant 0 : i32
    %c0_i32_1 = arith.constant 0 : i32
    return %c0_i32, %c0_i32_0 : i32, i32
  }
  func.func @transform_5(%arg0: i32, %arg1: i32) -> (i32, i32) {
    %c0_i32 = arith.constant 0 : i32
    %c0_i32_0 = arith.constant 0 : i32
    %c0_i32_1 = arith.constant 0 : i32
    return %c0_i32, %c0_i32_0 : i32, i32
  }
  func.func @transform_6(%arg0: i32, %arg1: i32) -> (i32, i32) {
    %c0_i32 = arith.constant 0 : i32
    %c0_i32_0 = arith.constant 0 : i32
    %c0_i32_1 = arith.constant 0 : i32
    return %c0_i32, %c0_i32_0 : i32, i32
  }
  func.func @transform_7(%arg0: i32, %arg1: i32) -> (i32, i32) {
    %c0_i32 = arith.constant 0 : i32
    %c0_i32_0 = arith.constant 0 : i32
    %c0_i32_1 = arith.constant 0 : i32
    return %c0_i32, %c0_i32_0 : i32, i32
  }
  func.func @transform_8(%arg0: i32, %arg1: i32) -> (i32, i32) {
    %c0_i32 = arith.constant 0 : i32
    %c0_i32_0 = arith.constant 0 : i32
    %c0_i32_1 = arith.constant 0 : i32
    return %c0_i32, %c0_i32_0 : i32, i32
  }
  func.func @transform_9(%arg0: i32, %arg1: i32) -> (i32, i32) {
    %c2_i32 = arith.constant 2 : i32
    %0 = arith.cmpi eq, %arg0, %c2_i32 : i32
    %c0_i32 = arith.constant 0 : i32
    %1 = arith.select %0, %arg1, %c0_i32 : i32
    %c0_i32_0 = arith.constant 0 : i32
    %c0_i32_1 = arith.constant 0 : i32
    return %1, %c0_i32_0 : i32, i32
  }
}

</mosaic_0001>

<bundles_post_ra>
// kernel: tpu_custom_call.1
= control target key start
LH: loop header
LB: loop body
LE: loop exit
PB: predicated region body
PF: predicated region fallthrough
CT: control target
= control target key end

     0   :  { %s1352_s11 = smov 0   ;;  %s1354_s12 = smov 0   ;;  %s1657_s0 = inlined_call_operand.vmem [shape: bf16[256,16], index: 0, kind: input, shape index: {}]   ;;  %s1658_s1 = inlined_call_operand.vmem [shape: bf16[16,32], index: 1, kind: input, shape index: {}]   ;;  %s1659_s2 = inlined_call_operand.vmem [shape: f32[1,32], index: 2, kind: input, shape index: {}]   ;;  %s1660_s3 = inlined_call_operand.vmem [shape: f32[1,32], index: 3, kind: input, shape index: {}]   ;;  %s1661_s4 = inlined_call_operand.vmem [shape: bf16[32,32], index: 4, kind: input, shape index: {}]   ;;  %s1662_s5 = inlined_call_operand.vmem [shape: f32[1,32], index: 5, kind: input, shape index: {}]   ;;  %s1663_s6 = inlined_call_operand.vmem [shape: f32[1,32], index: 6, kind: input, shape index: {}]   ;;  %s1664_s7 = inlined_call_operand.vmem [shape: bf16[32,1], index: 7, kind: input, shape index: {}]   ;;  %s1665_s8 = inlined_call_operand.<no memory space> [shape: f32[1,1], index: 8, kind: input, shape index: {}]   ;;  %s1666_s9 = inlined_call_operand.vmem [shape: f32[256,1], index: 9, kind: output, shape index: {}]  }
   0x1   :  { %v14_v0 = vstv %s1665_s8  ;;  %s1356_s13 = smov 0   ;;  %s1358_s14 = smov 0  }
   0x2   :  { %15 = vst [vmem:[#allocation6] sm:$0x1] %v14_v0  ;;  %s1360_s15 = smov 0  }
   0x3 LB: > { %s30_s8 = sadd.s32 1, %s1288_s13  ;;  %s33_s16 = sadd.s32 1, %s1292_s14  ;;  %s1296_s15 = sphi %s1360_s15, %s21_s15   ;;  %s1292_s14 = sphi %s1358_s14, %s1670_s14   ;;  %s1288_s13 = sphi %s1356_s13, %s1669_s13   ;;  %s1284_s12 = sphi %s1354_s12, %s1668_s12   ;;  %s1280_s11 = sphi %s1352_s11, %s1667_s11  }
   0x4   : > { %p31_p0 = scmp.ge.s32.totalorder %s30_s8, 4  ;;  %p1104_p1 = scmp.ge.s32.totalorder %s1296_s15, 1 }
   0x5   : > { %p306_p2 = scmp.lt.s32.totalorder %s1296_s15, 13 }
   0x6   : > { %s1672_s8 = smov (%p31_p0, %s30_s8), 0  ;;  %s1674_s16 = smov (!%p31_p0, %s33_s16), %s1292_s14 }
   0x7   : > { %p307_p3 = pnand %p1104_p1, %p306_p2  ;;  %p35_p4 = scmp.ge.s32.totalorder %s1674_s16, 3 }
   0x8   : > { %p350_p5 = scmp.eq.s32.totalorder (!%p307_p3), %s1284_s12, 2  ;;  %p370_p6 = scmp.eq.s32.totalorder (!%p307_p3), %s1280_s11, 3 }
   0x9   : > { %s1676_s16 = smov (%p35_p4, %s1674_s16), 0  ;;  %310 = sbr.rel (%p307_p3) target bundleno = 818 (0x332), region = 56 }
   0xa   : > { %s1105_s19 = sshll.u32 (!%p307_p3), %s1280_s11, 3  ;;  %p1118_p9 = scmp.ne.s32.totalorder (!%p307_p3), %s1284_s12, 0 }
   0xb   : > { %p345_p7 = scmp.lt.s32.totalorder (!%p307_p3), %s1105_s19, 31 }
   0xe   : > { %v361_v1 = vlaneseq  ;;  %v1245_v2 = vld [vmem:[%s1658_s1] sm:$0xff]   ;;  %s351_s20 = scalar_select %p350_p5, %s1280_s11, 0  ;;  %vm417_vm8 = vcmask 130048  }
   0xf   : > { %s371_s21 = scalar_select %p370_p6, 8, 64  ;;  %1160 = vmatprep.subr.bf16.mxu0 %v1245_v2  ;;  %1194 = vmatprep.subr.bf16.mxu1 %v1245_v2 }
  0x10   : > { %v1393_v3 = vshrl.u32 %v361_v1, 7  ;;  %s1107_s22 = sshll.u32 %s351_s20, 3  ;;  %1161 = vmatpush3.bf16.msra.mxu0 %v1245_v2  ;;  %1195 = vmatpush3.bf16.msra.mxu1 %v1245_v2  ;;  %s1678_s19 = smov (!%p345_p7, %s1105_s19), 31 }
  0x11   : > { %p353_p8 = scmp.lt.s32.totalorder %s1107_s22, 31  ;;  %v1416_v11 = vstv %s371_s21  ;;  %s1106_s23 = sshll.u32 %s1678_s19, 2 }
  0x12   : > { %v1396_v4 = vadd.s32 8, %v1393_v3  ;;  %v1399_v5 = vadd.s32 16, %v1393_v3  ;;  %v1402_v6 = vadd.s32 24, %v1393_v3  ;;  %v1405_v7 = vadd.s32 32, %v1393_v3  ;;  %s348_s27 = scalar_lea.vmem %s1657_s0, %s1106_s23  ;;  %p1119_p10 = scmp.ne.s32.totalorder (!%p1118_p9), %s1280_s11, 0 }
  0x13   : > { %v1408_v8 = vadd.s32 40, %v1393_v3  ;;  %v1411_v9 = vadd.s32 48, %v1393_v3  ;;  %v1414_v10 = vadd.s32 56, %v1393_v3  ;;  %vm373_vm0 = vcmp.lt.s32.totalorder %v1393_v3, %v1416_v11  ;;  %s1680_s22 = smov (!%p353_p8, %s1107_s22), 31  ;;  %v1246_v12 = vld [vmem:[%s348_s27] sm:$0xff]   ;;  %v1247_v13 = vld [vmem:[%s348_s27 + $0x10] sm:$0xff]  }
  0x14   : > { %vm374_vm1 = vcmp.lt.s32.totalorder %v1396_v4, %v1416_v11  ;;  %vm375_vm2 = vcmp.lt.s32.totalorder %v1399_v5, %v1416_v11  ;;  %vm376_vm3 = vcmp.lt.s32.totalorder %v1402_v6, %v1416_v11  ;;  %vm377_vm4 = vcmp.lt.s32.totalorder %v1405_v7, %v1416_v11  ;;  %s1108_s24 = sshll.u32 %s1680_s22, 3  ;;  %1162 = vmatprep.mubr.msk.bf16.mxu0 %vm417_vm8, %v1246_v12  ;;  %v1248_v14 = vld [vmem:[%s348_s27 + $0x8] sm:$0xff]   ;;  %v1249_v15 = vld [vmem:[%s348_s27 + $0x18] sm:$0xff]  }
  0x15   : > { %vm378_vm5 = vcmp.lt.s32.totalorder %v1408_v8, %v1416_v11  ;;  %vm379_vm6 = vcmp.lt.s32.totalorder %v1411_v9, %v1416_v11  ;;  %vm380_vm7 = vcmp.lt.s32.totalorder %v1414_v10, %v1416_v11  ;;  %s1440_s30 = scalar_lea.vmem %s1666_s9, %s1108_s24  ;;  %1166 = vmatprep.mubr.msk.bf16.mxu1 %vm417_vm8, %v1247_v13  ;;  %1163 = vmatmul.mubr.msk.bf16.vlgmr.msra.gmra.mxu0 %vm417_vm8, %v1248_v14 }
  0x16   : > { %1167 = vmatmul.mubr.msk.bf16.vlgmr.msra.gmra.mxu1 %vm417_vm8, %v1249_v15 }
  0xd5   : > { %v1442_v16 = vpop.f32.mrf.mxu0 }
  0xd6   : > { %v1444_v17 = vpop.f32.mrf.mxu1 }
  0xd7   : > { %v1446_v18 = vpop.f32.mrf.mxu0 }
  0xd8   : > { %v1448_v19 = vpop.f32.mrf.mxu1  ;;  %498 = sbr.rel (%p1118_p9) target bundleno = 263 (0x107), region = 60 }
  0xd9   : > { %v1450_v20 = vpop.f32.mrf.mxu0 }
  0xda   : > { %v1452_v21 = vpop.f32.mrf.mxu1 }
  0xdb   : > { %v1454_v22 = vpop.f32.mrf.mxu0 }
  0xdc   : > { %v1456_v23 = vpop.f32.mrf.mxu1 }
  0xdd   : > { %502 = sbr.rel (%p1119_p10) target bundleno = 229 (0xe5), region = 64 }
  0xe2   : > { %vm503_vm9 = vcmask 253952   ;;  %v1298_v24 = vmov 0.0  }
  0xe3   : > { %504 = vst.msk [vmem:[#allocation2] sm:$0x1] %vm503_vm9, %v1298_v24  ;;  %505 = vst.msk [vmem:[#allocation3] sm:$0x1] %vm503_vm9, %v1298_v24 }
  0xe4   : > { %506 = vst.msk [vmem:[#allocation4] sm:$0x1] %vm503_vm9, %v1298_v24  ;;  %507 = vst.msk [vmem:[#allocation5] sm:$0x1] %vm503_vm9, %v1298_v24 }
  0xe5 PF: > { %v524_v25 = vsel %vm373_vm0, %v1446_v18, 0.0  ;;  %v525_v26 = vsel %vm374_vm1, %v1454_v22, 0.0  ;;  %v526_v27 = vsel %vm375_vm2, %v1442_v16, 0.0  ;;  %v527_v28 = vsel %vm376_vm3, %v1450_v20, 0.0 }
  0xe6   : > { %vm533_vm10 = vcmask 261120   ;;  %v559_v29 = vmul.f32 %v524_v25, %v524_v25  ;;  %v560_v33 = vmul.f32 %v525_v26, %v525_v26  ;;  %v528_v34 = vsel %vm377_vm4, %v1448_v19, 0.0 }
  0xe7   : > { %v534_v30 = vsel %vm533_vm10, %v524_v25, 0.0  ;;  %v535_v31 = vsel %vm533_vm10, %v525_v26, 0.0  ;;  %v537_v32 = vsel %vm533_vm10, %v526_v27, 0.0  ;;  %v539_v36 = vsel %vm533_vm10, %v527_v28, 0.0 }
  0xe8   : > { %v536_v35 = vadd.f32 %v535_v31, %v534_v30  ;;  %v561_v37 = vmul.f32 %v526_v27, %v526_v27  ;;  %v562_v38 = vmul.f32 %v527_v28, %v527_v28  ;;  %v529_v39 = vsel %vm378_vm5, %v1456_v23, 0.0 }
  0xe9   : > { %v541_v41 = vsel %vm533_vm10, %v528_v34, 0.0  ;;  %v563_v42 = vmul.f32 %v528_v34, %v528_v34  ;;  %v567_v43 = vsel %vm533_vm10, %v559_v29, 0.0  ;;  %v568_v44 = vsel %vm533_vm10, %v560_v33, 0.0 }
  0xea   : > { %v538_v40 = vadd.f32 %v537_v32, %v536_v35  ;;  %v570_v45 = vsel %vm533_vm10, %v561_v37, 0.0  ;;  %v530_v46 = vsel %vm379_vm6, %v1444_v17, 0.0  ;;  %v569_v48 = vadd.f32 %v568_v44, %v567_v43  ;;  %v532_v32 = vld [vmem:[#allocation2] sm:$0x1]  ;;  %v558_v37 = vld [vmem:[#allocation3] sm:$0x1] }
  0xeb   : > { %v543_v49 = vsel %vm533_vm10, %v529_v39, 0.0  ;;  %v564_v50 = vmul.f32 %v529_v39, %v529_v39  ;;  %v572_v51 = vsel %vm533_vm10, %v562_v38, 0.0  ;;  %v531_v52 = vsel %vm380_vm7, %v1452_v21, 0.0 }
  0xec   : > { %v540_v47 = vadd.f32 %v539_v36, %v538_v40  ;;  %v571_v54 = vadd.f32 %v570_v45, %v569_v48  ;;  %v545_v55 = vsel %vm533_vm10, %v530_v46, 0.0  ;;  %v565_v56 = vmul.f32 %v530_v46, %v530_v46 }
  0xed   : > { %v574_v57 = vsel %vm533_vm10, %v563_v42, 0.0  ;;  %v547_v60 = vsel %vm533_vm10, %v531_v52, 0.0  ;;  %v566_v61 = vmul.f32 %v531_v52, %v531_v52  ;;  %v576_v62 = vsel %vm533_vm10, %v564_v50, 0.0 }
  0xee   : > { %v542_v53 = vadd.f32 %v541_v41, %v540_v47  ;;  %v573_v59 = vadd.f32 %v572_v51, %v571_v54  ;;  %v578_v1 = vsel %vm533_vm10, %v565_v56, 0.0  ;;  %vm556_vm11 = vcmask 253952  }
  0xef   : > { %v580_v13 = vsel %vm533_vm10, %v566_v61, 0.0 }
  0xf0   : > { %v544_v58 = vadd.f32 %v543_v49, %v542_v53  ;;  %v575_v0 = vadd.f32 %v574_v57, %v573_v59 }
  0xf2   : > { %v546_v63 = vadd.f32 %v545_v55, %v544_v58  ;;  %v577_v12 = vadd.f32 %v576_v62, %v575_v0 }
  0xf4   : > { %v548_v2 = vadd.f32 %v547_v60, %v546_v63  ;;  %v579_v15 = vadd.f32 %v578_v1, %v577_v12 }
  0xf6   : > { %v549_v14 = vrot.slane %v548_v2, 4  ;;  %v581_v25 = vadd.f32 %v580_v13, %v579_v15 }
  0xf8   : > { %v550_v24 = vadd.f32 %v549_v14, %v548_v2  ;;  %v582_v27 = vrot.slane %v581_v25, 4 }
  0xfa   : > { %v551_v26 = vrot.slane %v550_v24, 2  ;;  %v583_v29 = vadd.f32 %v582_v27, %v581_v25 }
  0xfc   : > { %v552_v28 = vadd.f32 %v551_v26, %v550_v24  ;;  %v584_v31 = vrot.slane %v583_v29, 2 }
  0xfe   : > { %v553_v30 = vrot.slane %v552_v28, 1  ;;  %v585_v34 = vadd.f32 %v584_v31, %v583_v29 }
 0x100   : > { %v554_v33 = vadd.f32 %v553_v30, %v552_v28  ;;  %v586_v36 = vrot.slane %v585_v34, 1 }
 0x102   : > { %v555_v35 = vadd.f32 %v554_v33, %v532_v32  ;;  %v587_v38 = vadd.f32 %v586_v36, %v585_v34 }
 0x104   : > { %557 = vst.msk [vmem:[#allocation2] sm:$0x1] %vm556_vm11, %v555_v35  ;;  %v588_v39 = vadd.f32 %v587_v38, %v558_v37 }
 0x106   : > { %589 = vst.msk [vmem:[#allocation3] sm:$0x1] %vm556_vm11, %v588_v39 }
 0x107 PF: > { %p1120_p11 = scmp.le.s32.totalorder %s1284_s12, 0 }
 0x108   : > { %p594_p12 = scmp.eq.s32.totalorder (!%p1120_p11), %s1284_s12, 1  ;;  %p595_p13 = scmp.eq.s32.totalorder (!%p1120_p11), %s1280_s11, 0 }
 0x109   : > { %593 = sbr.rel (%p1120_p11) target bundleno = 818 (0x332), region = 68 }
 0x10a   : > { %p596_p0 = pnand (!%p1120_p11), %p595_p13, %p594_p12 }
 0x10e   : > { %599 = sbr.rel (%p596_p0) target bundleno = 305 (0x131), region = 72 }
 0x113   : > { %v600_v40 = vld [vmem:[#allocation2] sm:$0x1]  ;;  %v602_v41 = vld [vmem:[#allocation3] sm:$0x1]  ;;  %vm610_vm12 = vcmask 253952  }
 0x114   : > { %v601_v42 = vmul.f32 0.005, %v600_v40  ;;  %v603_v43 = vmul.f32 0.005, %v602_v41  ;;  %v606_v47 = vld [vmem:[%s1659_s2] sm:$0x1] }
 0x115   : > { %v612_v50 = vld [vmem:[%s1660_s3] sm:$0x1] }
 0x116   : > { %v604_v44 = vmul.f32 %v601_v42, %v601_v42 }
 0x118   : > { %v605_v45 = vsub.f32 %v603_v43, %v604_v44 }
 0x11a   : > { %v607_v46 = vadd.f32 1e-05, %v605_v45 }
 0x11c   : > { %1250 = vrsqrt.f32 %v607_v46 }
 0x129   : > { %v1251_v48 = vpop.eup %1250 }
 0x12a   : > { %v609_v49 = vmul.f32 %v1251_v48, %v606_v47 }
 0x12c   : > { %611 = vst.msk [vmem:[#allocation2] sm:$0x1] %vm610_vm12, %v609_v49  ;;  %v613_v51 = vmul.f32 %v609_v49, %v601_v42 }
 0x12e   : > { %v614_v52 = vsub.f32 %v612_v50, %v613_v51 }
 0x130   : > { %615 = vst.msk [vmem:[#allocation3] sm:$0x1] %vm610_vm12, %v614_v52 }
 0x131 PF: > { %v1252_v53 = vld [vmem:[%s1661_s4 + $0x8] sm:$0xff]   ;;  %v1253_v54 = vld [vmem:[%s1661_s4] sm:$0xff]   ;;  %vm682_vm13 = vcmask 261120   ;;  %p1129_p1 = scmp.ne.s32.totalorder %s1284_s12, 1 }
 0x132   : > { %1170 = vmatprep.subr.bf16.mxu0 %v1252_v53  ;;  %1196 = vmatprep.subr.bf16.mxu1 %v1252_v53 }
 0x133   : > { %v1121_v55 = vld [vmem:[#allocation2] ss:$0 sm:$0xff]  ;;  %1171 = vmatpush3.bf16.msra.mxu0 %v1252_v53  ;;  %1198 = vmatpush3.bf16.msra.mxu1 %v1252_v53 }
 0x134   : > { %v623_v57 = vmul.f32 %v1121_v55, %v1446_v18  ;;  %v624_v58 = vmul.f32 %v1121_v55, %v1454_v22  ;;  %v627_v59 = vmul.f32 %v1121_v55, %v1448_v19  ;;  %1172 = vmatprep.subr.bf16.mxu0 %v1253_v54  ;;  %1197 = vmatprep.subr.bf16.mxu1 %v1253_v54 }
 0x135   : > { %v628_v60 = vmul.f32 %v1121_v55, %v1456_v23  ;;  %v625_v61 = vmul.f32 %v1442_v16, %v1121_v55  ;;  %v626_v62 = vmul.f32 %v1450_v20, %v1121_v55  ;;  %v629_v2 = vmul.f32 %v1444_v17, %v1121_v55 }
 0x136   : > { %v630_v22 = vmul.f32 %v1452_v21, %v1121_v55 }
 0x137   : > { %v1122_v56 = vld [vmem:[#allocation3] ss:$0 sm:$0xff]  ;;  %1173 = vmatpush3.bf16.msra.mxu0 %v1253_v54  ;;  %1199 = vmatpush3.bf16.msra.mxu1 %v1253_v54 }
 0x138   : > { %v638_v63 = vadd.f32 %v1122_v56, %v623_v57  ;;  %v639_v0 = vadd.f32 %v1122_v56, %v624_v58  ;;  %v642_v1 = vadd.f32 %v1122_v56, %v627_v59  ;;  %v643_v12 = vadd.f32 %v1122_v56, %v628_v60 }
 0x139   : > { %v640_v18 = vadd.f32 %v1122_v56, %v625_v61  ;;  %v641_v13 = vadd.f32 %v1122_v56, %v626_v62  ;;  %v644_v23 = vadd.f32 %v1122_v56, %v629_v2  ;;  %v645_v20 = vadd.f32 %v1122_v56, %v630_v22 }
 0x13a   : > { %v646_v19 = vmul.f32 0.01, %v638_v63  ;;  %v647_v14 = vmul.f32 0.01, %v639_v0  ;;  %v650_v15 = vmul.f32 0.01, %v642_v1 }
 0x13b   : > { %v651_v24 = vmul.f32 0.01, %v643_v12  ;;  %v648_v16 = vmul.f32 0.01, %v640_v18  ;;  %v649_v25 = vmul.f32 0.01, %v641_v13 }
 0x13c   : > { %v654_v26 = vmax.f32 %v638_v63, %v646_v19  ;;  %v655_v27 = vmax.f32 %v639_v0, %v647_v14  ;;  %v658_v28 = vmax.f32 %v642_v1, %v650_v15  ;;  %v652_v29 = vmul.f32 0.01, %v644_v23 }
 0x13d   : > { %v659_v17 = vmax.f32 %v643_v12, %v651_v24  ;;  %v656_v30 = vmax.f32 %v640_v18, %v648_v16  ;;  %v657_v31 = vmax.f32 %v641_v13, %v649_v25  ;;  %v653_v32 = vmul.f32 0.01, %v645_v20 }
 0x13e   : > { %v662_v33 = vpack.c.bf16 %v655_v27, %v654_v26  ;;  %v660_v21 = vmax.f32 %v644_v23, %v652_v29 }
 0x13f   : > { %v664_v34 = vpack.c.bf16 %v659_v17, %v658_v28  ;;  %v663_v35 = vpack.c.bf16 %v657_v31, %v656_v30  ;;  %v661_v36 = vmax.f32 %v645_v20, %v653_v32 }
 0x140   : > { %1174 = vmatprep.mubr.msk.bf16.mxu0 %vm682_vm13, %v662_v33 }
 0x141   : > { %1178 = vmatprep.mubr.msk.bf16.mxu1 %vm682_vm13, %v664_v34  ;;  %1175 = vmatmul.mubr.msk.bf16.vlgmr.msra.gmra.mxu0 %vm682_vm13, %v663_v35  ;;  %v665_v37 = vpack.c.bf16 %v661_v36, %v660_v21 }
 0x143   : > { %1179 = vmatmul.mubr.msk.bf16.vlgmr.msra.gmra.mxu1 %vm682_vm13, %v665_v37 }
 0x201   : > { %v1535_v38 = vpop.f32.mrf.mxu0 }
 0x203   : > { %v1537_v39 = vpop.f32.mrf.mxu1  ;;  %v1539_v40 = vpop.f32.mrf.mxu0 }
 0x205   : > { %v1541_v41 = vpop.f32.mrf.mxu1  ;;  %v1543_v42 = vpop.f32.mrf.mxu0  ;;  %762 = sbr.rel (%p1129_p1) target bundleno = 556 (0x22c), region = 76 }
 0x207   : > { %v1545_v43 = vpop.f32.mrf.mxu1  ;;  %v1547_v44 = vpop.f32.mrf.mxu0 }
 0x209   : > { %v1549_v45 = vpop.f32.mrf.mxu1 }
 0x20a   : > { %v779_v46 = vsel %vm373_vm0, %v1539_v40, 0.0  ;;  %v780_v47 = vsel %vm374_vm1, %v1547_v44, 0.0  ;;  %v781_v48 = vsel %vm375_vm2, %v1535_v38, 0.0  ;;  %v782_v49 = vsel %vm376_vm3, %v1543_v42, 0.0  ;;  %v787_v35 = vld [vmem:[#allocation4] sm:$0x1] }
 0x20b   : > { %v788_v50 = vsel %vm682_vm13, %v779_v46, 0.0  ;;  %v789_v3 = vsel %vm682_vm13, %v780_v47, 0.0  ;;  %v791_v51 = vsel %vm682_vm13, %v781_v48, 0.0  ;;  %v783_v4 = vsel %vm377_vm4, %v1541_v41, 0.0 }
 0x20c   : > { %v790_v52 = vadd.f32 %v789_v3, %v788_v50  ;;  %v793_v5 = vsel %vm682_vm13, %v782_v49, 0.0  ;;  %v813_v53 = vmul.f32 %v779_v46, %v779_v46  ;;  %v814_v54 = vmul.f32 %v780_v47, %v780_v47 }
 0x20d   : > { %v815_v56 = vmul.f32 %v781_v48, %v781_v48  ;;  %v816_v6 = vmul.f32 %v782_v49, %v782_v49  ;;  %v784_v57 = vsel %vm378_vm5, %v1549_v45, 0.0  ;;  %v795_v58 = vsel %vm682_vm13, %v783_v4, 0.0  ;;  %v812_v49 = vld [vmem:[#allocation5] sm:$0x1] }
 0x20e   : > { %v792_v55 = vadd.f32 %v791_v51, %v790_v52  ;;  %v821_v59 = vsel %vm682_vm13, %v813_v53, 0.0  ;;  %v817_v61 = vmul.f32 %v783_v4, %v783_v4  ;;  %v822_v7 = vsel %vm682_vm13, %v814_v54, 0.0 }
 0x20f   : > { %v824_v62 = vsel %vm682_vm13, %v815_v56, 0.0  ;;  %v785_v63 = vsel %vm379_vm6, %v1537_v39, 0.0  ;;  %v797_v0 = vsel %vm682_vm13, %v784_v57, 0.0  ;;  %v823_v1 = vadd.f32 %v822_v7, %v821_v59 }
 0x210   : > { %v794_v60 = vadd.f32 %v793_v5, %v792_v55  ;;  %v818_v2 = vmul.f32 %v784_v57, %v784_v57  ;;  %v826_v12 = vsel %vm682_vm13, %v816_v6, 0.0  ;;  %v786_v18 = vsel %vm380_vm7, %v1545_v43, 0.0 }
 0x211   : > { %v799_v13 = vsel %vm682_vm13, %v785_v63, 0.0  ;;  %v825_v22 = vadd.f32 %v824_v62, %v823_v1  ;;  %v819_v14 = vmul.f32 %v785_v63, %v785_v63  ;;  %v828_v9 = vsel %vm682_vm13, %v817_v61, 0.0 }
 0x212   : > { %v796_v8 = vadd.f32 %v795_v58, %v794_v60  ;;  %v801_v15 = vsel %vm682_vm13, %v786_v18, 0.0  ;;  %v820_v16 = vmul.f32 %v786_v18, %v786_v18  ;;  %v830_v25 = vsel %vm682_vm13, %v818_v2, 0.0 }
 0x213   : > { %v827_v23 = vadd.f32 %v826_v12, %v825_v22  ;;  %v832_v27 = vsel %vm682_vm13, %v819_v14, 0.0  ;;  %vm810_vm14 = vcmask 253952  }
 0x214   : > { %v798_v19 = vadd.f32 %v797_v0, %v796_v8  ;;  %v834_v28 = vsel %vm682_vm13, %v820_v16, 0.0 }
 0x215   : > { %v829_v20 = vadd.f32 %v828_v9, %v827_v23 }
 0x216   : > { %v800_v24 = vadd.f32 %v799_v13, %v798_v19 }
 0x217   : > { %v831_v10 = vadd.f32 %v830_v25, %v829_v20 }
 0x218   : > { %v802_v26 = vadd.f32 %v801_v15, %v800_v24 }
 0x219   : > { %v833_v29 = vadd.f32 %v832_v27, %v831_v10 }
 0x21a   : > { %v803_v11 = vrot.slane %v802_v26, 4 }
 0x21b   : > { %v835_v30 = vadd.f32 %v834_v28, %v833_v29 }
 0x21c   : > { %v804_v17 = vadd.f32 %v803_v11, %v802_v26 }
 0x21d   : > { %v836_v32 = vrot.slane %v835_v30, 4 }
 0x21e   : > { %v805_v31 = vrot.slane %v804_v17, 2 }
 0x21f   : > { %v837_v21 = vadd.f32 %v836_v32, %v835_v30 }
 0x220   : > { %v806_v33 = vadd.f32 %v805_v31, %v804_v17 }
 0x221   : > { %v838_v36 = vrot.slane %v837_v21, 2 }
 0x222   : > { %v807_v34 = vrot.slane %v806_v33, 1 }
 0x223   : > { %v839_v46 = vadd.f32 %v838_v36, %v837_v21 }
 0x224   : > { %v808_v37 = vadd.f32 %v807_v34, %v806_v33 }
 0x225   : > { %v840_v48 = vrot.slane %v839_v46, 1 }
 0x226   : > { %v809_v47 = vadd.f32 %v808_v37, %v787_v35 }
 0x227   : > { %v841_v50 = vadd.f32 %v840_v48, %v839_v46 }
 0x228   : > { %811 = vst.msk [vmem:[#allocation4] sm:$0x1] %vm810_vm14, %v809_v47 }
 0x229   : > { %v842_v3 = vadd.f32 %v841_v50, %v812_v49 }
 0x22b   : > { %843 = vst.msk [vmem:[#allocation5] sm:$0x1] %vm810_vm14, %v842_v3 }
 0x22c PF: > { %p1130_p2 = scmp.ne.s32.totalorder %s1284_s12, 2 }
 0x22d   : > { %p1131_p3 = scmp.ne.s32.totalorder (!%p1130_p2), %s1280_s11, 0 }
 0x22e   : > { %847 = sbr.rel (%p1130_p2) target bundleno = 818 (0x332), region = 80 }
 0x233   : > { %850 = sbr.rel (%p1131_p3) target bundleno = 598 (0x256), region = 84 }
 0x238   : > { %v851_v51 = vld [vmem:[#allocation4] sm:$0x1]  ;;  %v853_v52 = vld [vmem:[#allocation5] sm:$0x1]  ;;  %v857_v56 = vld [vmem:[%s1662_s5] sm:$0x1] }
 0x239   : > { %v852_v4 = vmul.f32 0.005, %v851_v51  ;;  %v854_v5 = vmul.f32 0.005, %v853_v52  ;;  %vm861_vm15 = vcmask 253952  }
 0x23a   : > { %v863_v58 = vld [vmem:[%s1663_s6] sm:$0x1] }
 0x23b   : > { %v855_v53 = vmul.f32 %v852_v4, %v852_v4 }
 0x23d   : > { %v856_v54 = vsub.f32 %v854_v5, %v855_v53 }
 0x23f   : > { %v858_v55 = vadd.f32 1e-05, %v856_v54 }
 0x241   : > { %1254 = vrsqrt.f32 %v858_v55 }
 0x24e   : > { %v1255_v6 = vpop.eup %1254 }
 0x24f   : > { %v860_v57 = vmul.f32 %v1255_v6, %v857_v56 }
 0x251   : > { %862 = vst.msk [vmem:[#allocation4] sm:$0x1] %vm861_vm15, %v860_v57  ;;  %v864_v59 = vmul.f32 %v860_v57, %v852_v4 }
 0x253   : > { %v865_v60 = vsub.f32 %v863_v58, %v864_v59 }
 0x255   : > { %866 = vst.msk [vmem:[#allocation5] sm:$0x1] %vm861_vm15, %v865_v60 }
 0x256 PF: > { %v1256_v61 = vld [vmem:[%s1664_s7 + $0x8] sm:$0xff]   ;;  %v1257_v7 = vld [vmem:[%s1664_s7] sm:$0xff]   ;;  %vm1017_vm0 = vcmask 7168  }
 0x257   : > { %1182 = vmatprep.subr.bf16.mxu0 %v1256_v61  ;;  %1200 = vmatprep.subr.bf16.mxu1 %v1256_v61  ;;  %v1134_v21 = vld [vmem:[#allocation6] ss:$0 sm:$0xff] }
 0x258   : > { %v1132_v62 = vld [vmem:[#allocation4] ss:$0 sm:$0xff]  ;;  %1183 = vmatpush3.bf16.msra.mxu0 %v1256_v61  ;;  %1202 = vmatpush3.bf16.msra.mxu1 %v1256_v61 }
 0x259   : > { %v874_v0 = vmul.f32 %v1132_v62, %v1539_v40  ;;  %v875_v1 = vmul.f32 %v1132_v62, %v1547_v44  ;;  %v878_v8 = vmul.f32 %v1132_v62, %v1541_v41  ;;  %1184 = vmatprep.subr.bf16.mxu0 %v1257_v7  ;;  %1201 = vmatprep.subr.bf16.mxu1 %v1257_v7 }
 0x25a   : > { %v879_v2 = vmul.f32 %v1132_v62, %v1549_v45  ;;  %v876_v12 = vmul.f32 %v1535_v38, %v1132_v62  ;;  %v877_v18 = vmul.f32 %v1543_v42, %v1132_v62  ;;  %v880_v14 = vmul.f32 %v1537_v39, %v1132_v62 }
 0x25b   : > { %v881_v44 = vmul.f32 %v1545_v43, %v1132_v62 }
 0x25c   : > { %v1133_v63 = vld [vmem:[#allocation5] ss:$0 sm:$0xff]  ;;  %1185 = vmatpush3.bf16.msra.mxu0 %v1257_v7  ;;  %1203 = vmatpush3.bf16.msra.mxu1 %v1257_v7 }
 0x25d   : > { %v889_v13 = vadd.f32 %v1133_v63, %v874_v0  ;;  %v890_v22 = vadd.f32 %v1133_v63, %v875_v1  ;;  %v893_v19 = vadd.f32 %v1133_v63, %v878_v8  ;;  %v894_v9 = vadd.f32 %v1133_v63, %v879_v2 }
 0x25e   : > { %v891_v15 = vadd.f32 %v1133_v63, %v876_v12  ;;  %v892_v40 = vadd.f32 %v1133_v63, %v877_v18  ;;  %v895_v45 = vadd.f32 %v1133_v63, %v880_v14  ;;  %v896_v42 = vadd.f32 %v1133_v63, %v881_v44 }
 0x25f   : > { %v897_v41 = vmul.f32 0.01, %v889_v13  ;;  %v898_v23 = vmul.f32 0.01, %v890_v22  ;;  %v901_v24 = vmul.f32 0.01, %v893_v19 }
 0x260   : > { %v902_v16 = vmul.f32 0.01, %v894_v9  ;;  %v899_v38 = vmul.f32 0.01, %v891_v15  ;;  %v900_v25 = vmul.f32 0.01, %v892_v40 }
 0x261   : > { %v905_v20 = vmax.f32 %v889_v13, %v897_v41  ;;  %v906_v26 = vmax.f32 %v890_v22, %v898_v23  ;;  %v909_v27 = vmax.f32 %v893_v19, %v901_v24  ;;  %v903_v10 = vmul.f32 0.01, %v895_v45 }
 0x262   : > { %v910_v39 = vmax.f32 %v894_v9, %v902_v16  ;;  %v907_v11 = vmax.f32 %v891_v15, %v899_v38  ;;  %v908_v28 = vmax.f32 %v892_v40, %v900_v25  ;;  %v904_v29 = vmul.f32 0.01, %v896_v42 }
 0x263   : > { %v913_v17 = vpack.c.bf16 %v906_v26, %v905_v20  ;;  %v911_v43 = vmax.f32 %v895_v45, %v903_v10 }
 0x264   : > { %v915_v30 = vpack.c.bf16 %v910_v39, %v909_v27  ;;  %v914_v31 = vpack.c.bf16 %v908_v28, %v907_v11  ;;  %v912_v32 = vmax.f32 %v896_v42, %v904_v29 }
 0x265   : > { %1186 = vmatprep.mubr.msk.bf16.mxu0 %vm682_vm13, %v913_v17 }
 0x266   : > { %1190 = vmatprep.mubr.msk.bf16.mxu1 %vm682_vm13, %v915_v30  ;;  %1187 = vmatmul.mubr.msk.bf16.vlgmr.msra.gmra.mxu0 %vm682_vm13, %v914_v31  ;;  %v916_v33 = vpack.c.bf16 %v912_v32, %v911_v43 }
 0x268   : > { %1191 = vmatmul.mubr.msk.bf16.vlgmr.msra.gmra.mxu1 %vm682_vm13, %v916_v33 }
 0x326   : > { %v1188_v34 = vpop.f32.mrf.mxu0 }
 0x327   : > { %v995_v35 = vadd.f32 %v1188_v34, %v1134_v21 }
 0x328   : > { %v1192_v36 = vpop.f32.mrf.mxu1  ;;  %v986_v37 = vpop.f32.mrf.mxu0 }
 0x329   : > { %1020 = vst.msk [vmem:[%s1440_s30 + $0x10] sm:$0xff] %vm1017_vm0, %v995_v35  ;;  %v1011_v46 = vadd.f32 %v1192_v36, %v1134_v21  ;;  %v987_v47 = vadd.f32 %v1134_v21, %v986_v37 }
 0x32a   : > { %v1002_v48 = vpop.f32.mrf.mxu1  ;;  %v1189_v49 = vpop.f32.mrf.mxu0 }
 0x32b   : > { %1024 = vst.msk [vmem:[%s1440_s30 + $0x30] sm:$0xff] %vm1017_vm0, %v1011_v46  ;;  %1018 = vst.msk [vmem:[%s1440_s30] sm:$0xff] %vm1017_vm0, %v987_v47  ;;  %v1003_v50 = vadd.f32 %v1134_v21, %v1002_v48  ;;  %v998_v3 = vadd.f32 %v1189_v49, %v1134_v21 }
 0x32c   : > { %v1193_v51 = vpop.f32.mrf.mxu1  ;;  %v989_v52 = vpop.f32.mrf.mxu0 }
 0x32d   : > { %1022 = vst.msk [vmem:[%s1440_s30 + $0x20] sm:$0xff] %vm1017_vm0, %v1003_v50  ;;  %1021 = vst.msk [vmem:[%s1440_s30 + $0x18] sm:$0xff] %vm1017_vm0, %v998_v3  ;;  %v1014_v4 = vadd.f32 %v1193_v51, %v1134_v21  ;;  %v990_v5 = vadd.f32 %v1134_v21, %v989_v52 }
 0x32e   : > { %v1005_v53 = vpop.f32.mrf.mxu1 }
 0x32f   : > { %1025 = vst.msk [vmem:[%s1440_s30 + $0x38] sm:$0xff] %vm1017_vm0, %v1014_v4  ;;  %1019 = vst.msk [vmem:[%s1440_s30 + $0x8] sm:$0xff] %vm1017_vm0, %v990_v5  ;;  %v1006_v54 = vadd.f32 %v1134_v21, %v1005_v53 }
 0x331   : > { %1023 = vst.msk [vmem:[%s1440_s30 + $0x28] sm:$0xff] %vm1017_vm0, %v1006_v54 }
 0x332 PF: > { %s21_s15 = sadd.s32 1, %s1296_s15   ;;  %s1667_s11 = smov %s1288_s13 }
 0x333   : > { %p18_p4 = scmp.ge.s32.totalorder %s21_s15, 14   ;;  %s1668_s12 = smov %s1292_s14 }
 0x334   : > { %s1669_s13 = smov %s1672_s8  ;;  %s1670_s14 = smov %s1676_s16 }
 0x335   :  { %20 = sbr.rel (!%p18_p4) target bundleno = 3 (0x3), region = 114 }

</bundles_post_ra>
